<compile_context>
chip_gen: v7x
topology: tpu7x:2x2x1
jax: 0.10.0
libtpu: 0.0.40
codegen_flags: <defaults>
</compile_context>

<pallas_src>
import jax
import jax.numpy as jnp
from jax.experimental import pallas as pl
from jax.experimental.pallas import tpu as pltpu


def _round_up(x, m):
    return ((x + m - 1) // m) * m


def _mlp_kernel(x_ref, w1_ref, b1_ref, w2_ref, b2_ref, w3_ref, b3_ref, o_ref):
    # One batch tile per grid step; weights/biases are the same (VMEM-resident)
    # block every step. MXU matmuls use bf16 (or f32) operands with f32
    # accumulation; bias add / ReLU / tanh run in f32 on the VPU/EUP.
    op_dtype = w1_ref.dtype

    # In-kernel cast of the input tile (saves a wrapper-side XLA pass over x).
    x = x_ref[...].astype(op_dtype)

    # Layer 1: Linear + ReLU
    h1 = jnp.dot(x, w1_ref[...], preferred_element_type=jnp.float32) + b1_ref[...]
    h1 = jnp.maximum(h1, 0.0)

    # Layer 2: Linear + ReLU
    h2 = jnp.dot(h1.astype(op_dtype), w2_ref[...], preferred_element_type=jnp.float32) + b2_ref[...]
    h2 = jnp.maximum(h2, 0.0)

    # Layer 3: Linear + tanh (EUP transcendental); true action_dim columns, no padding.
    z3 = jnp.dot(h2.astype(op_dtype), w3_ref[...], preferred_element_type=jnp.float32) + b3_ref[...]
    o_ref[...] = jnp.tanh(z3).astype(o_ref.dtype)


def mlp_forward(state, params, *, block_batch=1024, use_bf16=True):
    """state: [B, state_dim] float32. params: dict of w1,b1,w2,b2,w3,b3 (float32)."""
    w1, b1, w2, b2, w3, b3 = (params[k] for k in ("w1", "b1", "w2", "b2", "w3", "b3"))
    B, state_dim = state.shape
    h1_dim = w1.shape[1]
    h2_dim = w2.shape[1]
    action_dim = w3.shape[1]

    # --- batch tiling: TB rows per grid step; no wrapper-side padding of x.
    # Ragged last tile is fine: rows are independent and OOB output rows are not stored.
    TB = min(block_batch, _round_up(B, 8))
    grid = (pl.cdiv(B, TB),)

    # --- operand dtypes: bf16 weights into the MXU (tiny arrays), f32 biases ---
    op_dtype = jnp.bfloat16 if use_bf16 else jnp.float32
    w1c, w2c, w3c = (w.astype(op_dtype) for w in (w1, w2, w3))
    b1c, b2c, b3c = (b.astype(jnp.float32) for b in (b1, b2, b3))

    w_itemsize = jnp.dtype(op_dtype).itemsize
    flops = 2 * B * (state_dim * h1_dim + h1_dim * h2_dim + h2_dim * action_dim)
    bytes_accessed = (
        B * state_dim * state.dtype.itemsize                     # input (f32, cast in-kernel)
        + (w1c.size + w2c.size + w3c.size) * w_itemsize          # resident weights
        + (b1c.size + b2c.size + b3c.size) * 4                   # biases (f32)
        + B * action_dim * 4                                     # unpadded output (f32)
    )
    cost = pl.CostEstimate(
        flops=flops, transcendentals=B * action_dim, bytes_accessed=bytes_accessed
    )

    out = pl.pallas_call(
        _mlp_kernel,
        out_shape=jax.ShapeDtypeStruct((B, action_dim), jnp.float32),
        grid=grid,
        in_specs=[
            pl.BlockSpec((TB, state_dim), lambda i: (i, 0)),     # activation tile
            pl.BlockSpec(w1c.shape, lambda i: (0, 0)),           # resident weights/biases
            pl.BlockSpec(b1c.shape, lambda i: (0, 0)),
            pl.BlockSpec(w2c.shape, lambda i: (0, 0)),
            pl.BlockSpec(b2c.shape, lambda i: (0, 0)),
            pl.BlockSpec(w3c.shape, lambda i: (0, 0)),
            pl.BlockSpec(b3c.shape, lambda i: (0, 0)),
        ],
        out_specs=pl.BlockSpec((TB, action_dim), lambda i: (i, 0)),
        compiler_params=pltpu.CompilerParams(dimension_semantics=("parallel",)),
        cost_estimate=cost,
    )(state, w1c, b1c, w2c, b2c, w3c, b3c)

    return out


def xavier_uniform(key, fan_in, fan_out, dtype=jnp.float32):
    # matches torch.nn.init.xavier_uniform_ with gain=1
    limit = jnp.sqrt(6.0 / (fan_in + fan_out)).astype(dtype)
    return jax.random.uniform(key, (fan_in, fan_out), dtype=dtype, minval=-limit, maxval=limit)


def init_mlp_params(key, state_dim, action_dim):
    k1, k2, k3 = jax.random.split(key, 3)
    return {
        "w1": xavier_uniform(k1, state_dim, 64),
        "b1": jnp.zeros((1, 64), jnp.float32),
        "w2": xavier_uniform(k2, 64, 32),
        "b2": jnp.zeros((1, 32), jnp.float32),
        "w3": xavier_uniform(k3, 32, action_dim),
        "b3": jnp.zeros((1, action_dim), jnp.float32),
    }


def mlp_reference(state, params, *, use_bf16=False):
    """Pure-jnp reference. With use_bf16=True it mirrors the kernel's MXU operand
    precision (bf16 operands, f32 accumulation, f32 elementwise)."""
    op = jnp.bfloat16 if use_bf16 else jnp.float32
    w1, w2, w3 = (params[k].astype(op) for k in ("w1", "w2", "w3"))
    b1, b2, b3 = (params[k] for k in ("b1", "b2", "b3"))
    h1 = jnp.maximum(
        jnp.dot(state.astype(op), w1, preferred_element_type=jnp.float32) + b1, 0.0)
    h2 = jnp.maximum(
        jnp.dot(h1.astype(op), w2, preferred_element_type=jnp.float32) + b2, 0.0)
    return jnp.tanh(jnp.dot(h2.astype(op), w3, preferred_element_type=jnp.float32) + b3)


if __name__ == "__main__":
    key = jax.random.PRNGKey(0)
    k_param, k_state = jax.random.split(key)

    batch, state_dim, action_dim = 8, 16, 4
    params = init_mlp_params(k_param, state_dim, action_dim)
    state = jax.random.normal(k_state, (batch, state_dim), dtype=jnp.float32)

    # Small-batch path (single tile, unpadded output)
    out = jax.block_until_ready(mlp_forward(state, params))
    ref_bf16 = jax.block_until_ready(mlp_reference(state, params, use_bf16=True))
    ref_f32 = jax.block_until_ready(mlp_reference(state, params, use_bf16=False))
    assert out.shape == (batch, action_dim)
    assert jnp.allclose(out, ref_bf16, atol=1e-3, rtol=1e-3)   # precision-matched ref
    assert jnp.allclose(out, ref_f32, atol=3e-2, rtol=3e-2)    # full-f32 semantics ref

    # Large-batch path (multiple grid tiles + ragged last tile, resident weights)
    big_state = jax.random.normal(k_state, (3000, state_dim), dtype=jnp.float32)
    big_out = jax.block_until_ready(mlp_forward(big_state, params))
    big_ref = mlp_reference(big_state, params, use_bf16=True)
    assert big_out.shape == (3000, action_dim)
    assert jnp.allclose(big_out, big_ref, atol=1e-3, rtol=1e-3)

    print("KERNEL_OK")
</pallas_src>

<mosaic_0001>
module attributes {stable_mosaic.version = 11 : i64} {
  func.func @_mlp_kernel(%arg0: i32, %arg1: memref<8x16xf32, #tpu.memory_space<vmem>>, %arg2: memref<16x64xbf16, #tpu.memory_space<vmem>>, %arg3: memref<1x64xf32, #tpu.memory_space<vmem>>, %arg4: memref<64x32xbf16, #tpu.memory_space<vmem>>, %arg5: memref<1x32xf32, #tpu.memory_space<vmem>>, %arg6: memref<32x4xbf16, #tpu.memory_space<vmem>>, %arg7: memref<1x4xf32, #tpu.memory_space<vmem>>, %arg8: memref<8x4xf32, #tpu.memory_space<vmem>>) attributes {dimension_semantics = [#tpu.dimension_semantics<parallel>], iteration_bounds = array<i64: 1>, scalar_prefetch = 0 : i64, scratch_operands = 0 : i64, tpu.core_type = #tpu.core_type<tc>, window_params = [{transform_indices = @transform_0, window_bounds = array<i64: 8, 16>}, {pipeline_mode = #tpu.pipeline_mode<synchronous>, transform_indices = @transform_1, window_bounds = array<i64: 16, 64>}, {pipeline_mode = #tpu.pipeline_mode<synchronous>, transform_indices = @transform_2, window_bounds = array<i64: 1, 64>}, {pipeline_mode = #tpu.pipeline_mode<synchronous>, transform_indices = @transform_3, window_bounds = array<i64: 64, 32>}, {pipeline_mode = #tpu.pipeline_mode<synchronous>, transform_indices = @transform_4, window_bounds = array<i64: 1, 32>}, {pipeline_mode = #tpu.pipeline_mode<synchronous>, transform_indices = @transform_5, window_bounds = array<i64: 32, 4>}, {pipeline_mode = #tpu.pipeline_mode<synchronous>, transform_indices = @transform_6, window_bounds = array<i64: 1, 4>}, {transform_indices = @transform_7, window_bounds = array<i64: 8, 4>}]} {
    %c0 = arith.constant 0 : index
    %c0_0 = arith.constant 0 : index
    %0 = vector.load %arg1[%c0, %c0_0] : memref<8x16xf32, #tpu.memory_space<vmem>>, vector<8x16xf32>
    %1 = arith.truncf %0 : vector<8x16xf32> to vector<8x16xbf16>
    %c0_1 = arith.constant 0 : index
    %c0_2 = arith.constant 0 : index
    %2 = vector.load %arg2[%c0_1, %c0_2] : memref<16x64xbf16, #tpu.memory_space<vmem>>, vector<16x64xbf16>
    %cst = arith.constant dense<0.000000e+00> : vector<8x64xf32>
    %3 = tpu.matmul %1, %2, %cst {dimension_numbers = #tpu.dot_dimension_numbers<[1], [0], [0], [1], [0, 0, 1, 1], [], []>} : vector<8x16xbf16>, vector<16x64xbf16>, vector<8x64xf32> -> vector<8x64xf32>
    %c0_3 = arith.constant 0 : index
    %c0_4 = arith.constant 0 : index
    %4 = vector.load %arg3[%c0_3, %c0_4] : memref<1x64xf32, #tpu.memory_space<vmem>>, vector<1x64xf32>
    %5 = vector.broadcast %4 : vector<1x64xf32> to vector<8x64xf32>
    %6 = arith.addf %3, %5 : vector<8x64xf32>
    %cst_5 = arith.constant 0.000000e+00 : f32
    %7 = vector.broadcast %cst_5 : f32 to vector<8x64xf32>
    %8 = arith.maximumf %6, %7 : vector<8x64xf32>
    %9 = arith.truncf %8 : vector<8x64xf32> to vector<8x64xbf16>
    %c0_6 = arith.constant 0 : index
    %c0_7 = arith.constant 0 : index
    %10 = vector.load %arg4[%c0_6, %c0_7] : memref<64x32xbf16, #tpu.memory_space<vmem>>, vector<64x32xbf16>
    %cst_8 = arith.constant dense<0.000000e+00> : vector<8x32xf32>
    %11 = tpu.matmul %9, %10, %cst_8 {dimension_numbers = #tpu.dot_dimension_numbers<[1], [0], [0], [1], [0, 0, 1, 1], [], []>} : vector<8x64xbf16>, vector<64x32xbf16>, vector<8x32xf32> -> vector<8x32xf32>
    %c0_9 = arith.constant 0 : index
    %c0_10 = arith.constant 0 : index
    %12 = vector.load %arg5[%c0_9, %c0_10] : memref<1x32xf32, #tpu.memory_space<vmem>>, vector<1x32xf32>
    %13 = vector.broadcast %12 : vector<1x32xf32> to vector<8x32xf32>
    %14 = arith.addf %11, %13 : vector<8x32xf32>
    %cst_11 = arith.constant 0.000000e+00 : f32
    %15 = vector.broadcast %cst_11 : f32 to vector<8x32xf32>
    %16 = arith.maximumf %14, %15 : vector<8x32xf32>
    %17 = arith.truncf %16 : vector<8x32xf32> to vector<8x32xbf16>
    %c0_12 = arith.constant 0 : index
    %c0_13 = arith.constant 0 : index
    %18 = vector.load %arg6[%c0_12, %c0_13] : memref<32x4xbf16, #tpu.memory_space<vmem>>, vector<32x4xbf16>
    %cst_14 = arith.constant dense<0.000000e+00> : vector<8x4xf32>
    %19 = tpu.matmul %17, %18, %cst_14 {dimension_numbers = #tpu.dot_dimension_numbers<[1], [0], [0], [1], [0, 0, 1, 1], [], []>} : vector<8x32xbf16>, vector<32x4xbf16>, vector<8x4xf32> -> vector<8x4xf32>
    %c0_15 = arith.constant 0 : index
    %c0_16 = arith.constant 0 : index
    %20 = vector.load %arg7[%c0_15, %c0_16] : memref<1x4xf32, #tpu.memory_space<vmem>>, vector<1x4xf32>
    %21 = vector.broadcast %20 : vector<1x4xf32> to vector<8x4xf32>
    %22 = arith.addf %19, %21 : vector<8x4xf32>
    %23 = math.tanh %22 : vector<8x4xf32>
    %c0_17 = arith.constant 0 : index
    %c0_18 = arith.constant 0 : index
    %24 = vector.load %arg8[%c0_17, %c0_18] : memref<8x4xf32, #tpu.memory_space<vmem>>, vector<8x4xf32>
    tpu.vector_store %arg8[%c0_17, %c0_18], %23 {strides = array<i32>} : memref<8x4xf32, #tpu.memory_space<vmem>>, vector<8x4xf32>,
    return
  }
  func.func @transform_0(%arg0: i32) -> (i32, i32) {
    %c0_i32 = arith.constant 0 : i32
    %c0_i32_0 = arith.constant 0 : i32
    return %arg0, %c0_i32 : i32, i32
  }
  func.func @transform_1(%arg0: i32) -> (i32, i32) {
    %c0_i32 = arith.constant 0 : i32
    %c0_i32_0 = arith.constant 0 : i32
    %c0_i32_1 = arith.constant 0 : i32
    return %c0_i32, %c0_i32_0 : i32, i32
  }
  func.func @transform_2(%arg0: i32) -> (i32, i32) {
    %c0_i32 = arith.constant 0 : i32
    %c0_i32_0 = arith.constant 0 : i32
    %c0_i32_1 = arith.constant 0 : i32
    return %c0_i32, %c0_i32_0 : i32, i32
  }
  func.func @transform_3(%arg0: i32) -> (i32, i32) {
    %c0_i32 = arith.constant 0 : i32
    %c0_i32_0 = arith.constant 0 : i32
    %c0_i32_1 = arith.constant 0 : i32
    return %c0_i32, %c0_i32_0 : i32, i32
  }
  func.func @transform_4(%arg0: i32) -> (i32, i32) {
    %c0_i32 = arith.constant 0 : i32
    %c0_i32_0 = arith.constant 0 : i32
    %c0_i32_1 = arith.constant 0 : i32
    return %c0_i32, %c0_i32_0 : i32, i32
  }
  func.func @transform_5(%arg0: i32) -> (i32, i32) {
    %c0_i32 = arith.constant 0 : i32
    %c0_i32_0 = arith.constant 0 : i32
    %c0_i32_1 = arith.constant 0 : i32
    return %c0_i32, %c0_i32_0 : i32, i32
  }
  func.func @transform_6(%arg0: i32) -> (i32, i32) {
    %c0_i32 = arith.constant 0 : i32
    %c0_i32_0 = arith.constant 0 : i32
    %c0_i32_1 = arith.constant 0 : i32
    return %c0_i32, %c0_i32_0 : i32, i32
  }
  func.func @transform_7(%arg0: i32) -> (i32, i32) {
    %c0_i32 = arith.constant 0 : i32
    %c0_i32_0 = arith.constant 0 : i32
    return %arg0, %c0_i32 : i32, i32
  }
}

</mosaic_0001>

<bundles_post_ra>
// kernel: tpu_custom_call.1
= control target key start
LH: loop header
LB: loop body
LE: loop exit
PB: predicated region body
PF: predicated region fallthrough
CT: control target
= control target key end

     0   :  { %v309_v0 = vmov 0.0   ;;  %vm310_vm0 = vmmov 0   ;;  %vm44_vm1 = vcmask 130048   ;;  %vm129_vm2 = vcmask 523264   ;;  %s387_s1 = inlined_call_operand.vmem [shape: bf16[16,64], index: 1, kind: input, shape index: {}]   ;;  %s388_s0 = inlined_call_operand.vmem [shape: f32[8,16], index: 0, kind: input, shape index: {}]   ;;  %s389_s3 = inlined_call_operand.vmem [shape: bf16[64,32], index: 3, kind: input, shape index: {}]   ;;  %s390_s5 = inlined_call_operand.vmem [shape: bf16[32,4], index: 5, kind: input, shape index: {}]   ;;  %s391_s2 = inlined_call_operand.vmem [shape: f32[1,64], index: 2, kind: input, shape index: {}]   ;;  %s392_s4 = inlined_call_operand.vmem [shape: f32[1,32], index: 4, kind: input, shape index: {}]   ;;  %s393_s6 = inlined_call_operand.vmem [shape: f32[1,4], index: 6, kind: input, shape index: {}]   ;;  %s394_s7 = inlined_call_operand.vmem [shape: f32[8,4], index: 7, kind: output, shape index: {}]  }
   0x1   :  { %272 = vmatprep.subr.bf16.mxu0 %v309_v0  ;;  %v300_v1 = vld [vmem:[%s387_s1] sm:$0xff]   ;;  %274 = vmatprep.mubr.msk.bf16.mxu0 %vm310_vm0, %v309_v0  ;;  %v302_v5 = vld [vmem:[%s389_s3 + $0x8] sm:$0xff]   ;;  %v303_v6 = vld [vmem:[%s389_s3 + $0x10] sm:$0xff]   ;;  %vm198_vm3 = vcmask 261120   ;;  %vm243_vm4 = vcmask 31744  }
   0x2   :  { %v27_v2 = vld [vmem:[%s388_s0] sm:$0xff]  ;;  %278 = vmatprep.subr.bf16.mxu1 %v309_v0  ;;  %286 = vmatprep.mubr.msk.bf16.mxu1 %vm310_vm0, %v309_v0  ;;  %v304_v7 = vld [vmem:[%s389_s3 + $0x18] sm:$0xff]   ;;  %v306_v17 = vld [vmem:[%s390_s5 + $0x8] sm:$0xff]  }
   0x3   :  { %273 = vmatpush3.bf16.msra.mxu0 %v300_v1  ;;  %v28_v3 = vpack.c.bf16 %v27_v2, %v27_v2  ;;  %v301_v4 = vld [vmem:[%s389_s3] sm:$0xff]  }
   0x4   :  { %290 = vmatprep.subr.bf16.mxu0 %v309_v0  ;;  %279 = vmatpush3.bf16.msra.mxu1 %v301_v4  ;;  %v305_v8 = vld [vmem:[%s390_s5] sm:$0xff]  }
   0x5   :  { %280 = vmatprep.subr.bf16.mxu1 %v309_v0  ;;  %v249_v9 = vld [vmem:[%s391_s2] ss:$0 sm:$0xff] }
   0x6   :  { %275 = vmatmul.mubr.msk.bf16.vlgmr.msra.gmra.mrb[0].mxu0 %vm44_vm1, %v28_v3  ;;  %v252_v18 = vld [vmem:[%s392_s4] ss:$0 sm:$0xff] }
   0x7   :  { %294 = vmatprep.mubr.msk.bf16.mxu0 %vm310_vm0, %v309_v0  ;;  %291 = vmatpush3.bf16.msra.mxu0 %v305_v8  ;;  %v258_v26 = vld [vmem:[%s393_s6] ss:$0 sm:$0xff] }
   0x8   :  { %281 = vmatpush3.bf16.msra.mxu1 %v302_v5  ;;  %292 = vmatprep.subr.bf16.mxu0 %v309_v0 }
   0x9   :  { %282 = vmatprep.subr.bf16.mxu1 %v309_v0 }
   0xb   :  { %293 = vmatpush3.bf16.msra.mxu0 %v306_v17 }
   0xc   :  { %283 = vmatpush3.bf16.msra.mxu1 %v303_v6 }
   0xd   :  { %284 = vmatprep.subr.bf16.mxu1 %v309_v0 }
  0x10   :  { %285 = vmatpush3.bf16.msra.mxu1 %v304_v7 }
  0xd9   :  { %v82_v10 = vpop.f32.mrb[0].mxu0 }
  0xda   :  { %v83_v11 = vadd.f32 %v249_v9, %v82_v10  ;;  %v276_v12 = vpop.f32.mrb[1].mxu0 }
  0xdb   :  { %v85_v13 = vpop.f32.mrb[2].mxu0 }
  0xdc   :  { %v88_v14 = vmax.f32 %v83_v11, 0.0  ;;  %v277_v15 = vpop.f32.mrb[3].mxu0 }
  0xde   :  { %v89_v16 = vpack.c.bf16 %v88_v14, %v88_v14 }
  0xe0   :  { %287 = vmatmul.mubr.msk.bf16.vlgmr.msra.gmra.mrb[0].mxu1 %vm129_vm2, %v89_v16 }
 0x1b3   :  { %v167_v19 = vpop.f32.mrb[0].mxu1 }
 0x1b4   :  { %v168_v20 = vadd.f32 %v252_v18, %v167_v19  ;;  %v288_v21 = vpop.f32.mrb[1].mxu1 }
 0x1b5   :  { %v170_v22 = vpop.f32.mrb[2].mxu1 }
 0x1b6   :  { %v173_v23 = vmax.f32 %v168_v20, 0.0  ;;  %v289_v24 = vpop.f32.mrb[3].mxu1 }
 0x1b8   :  { %v174_v25 = vpack.c.bf16 %v173_v23, %v173_v23 }
 0x1ba   :  { %295 = vmatmul.mubr.msk.bf16.vlgmr.msra.gmra.mrb[4].mxu0 %vm198_vm3, %v174_v25 }
 0x28d   :  { %v236_v27 = vpop.f32.mrb[4].mxu0 }
 0x28e   :  { %v237_v28 = vadd.f32 %v258_v26, %v236_v27  ;;  %v296_v29 = vpop.f32.mrb[5].mxu0 }
 0x28f   :  { %v239_v30 = vpop.f32.mrb[6].mxu0 }
 0x290   :  { %307 = vtanh.f32 %v237_v28  ;;  %v297_v31 = vpop.f32.mrb[7].mxu0 }
 0x29a   :  { %v308_v32 = vpop.eup %307 }
 0x29b   :  { %244 = vst.msk [vmem:[%s394_s7] sm:$0xff] %vm243_vm4, %v308_v32 }

</bundles_post_ra>
